<compile_context>
chip_gen: v7x
topology: tpu7x:2x2x1
jax: 0.10.0
libtpu: 0.0.40
codegen_flags: <defaults>
</compile_context>

<pallas_src>
import functools

import jax
import jax.numpy as jnp
from jax.experimental import pallas as pl
from jax.experimental.pallas import tpu as pltpu

MIN_VAL = -1.0
MAX_VAL = 1.0


def _hardtanh_kernel(x_ref, o_ref, *, min_val, max_val):
    x = x_ref[...]
    lo = jnp.asarray(min_val, dtype=x.dtype)
    hi = jnp.asarray(max_val, dtype=x.dtype)
    o_ref[...] = jnp.minimum(jnp.maximum(x, lo), hi)


def _tile_and_vmem_limit():
    """Generation-aware (tile_bytes, scoped-VMEM limit)."""
    tile_bytes = 4 << 20       # v5e/v6e sweet spot: 4 bufs x 4 MiB = 16 MiB live
    vmem_limit = 32 << 20      # above v5e's 16 MiB scoped default; safe everywhere
    try:
        vmem_phys = getattr(pltpu.get_tpu_info(), "vmem_capacity_bytes", None)
    except Exception:
        vmem_phys = None
    if vmem_phys is not None and vmem_phys <= (64 << 20):
        # v7x-class TensorCore (64 MiB VMEM, ~3.2 TB/s HBM): bigger tiles to
        # amortize the ~0.35us per-grid-step overhead; raise scoped VMEM to fit
        # 4 x 8 MiB double-buffered in+out with headroom (< 64 MiB physical).
        tile_bytes = 8 << 20
        vmem_limit = 48 << 20
    return tile_bytes, vmem_limit


def _choose_cols(n):
    """Widest lane-dense column count (multiple of 128) dividing n, else None."""
    for c in (2048, 1024, 512, 256, 128):
        if n % c == 0:
            return c
    return None


def _round_up(v, m):
    return ((v + m - 1) // m) * m


def hardtanh(x, min_val=MIN_VAL, max_val=MAX_VAL, *, donate=False):
    """Elementwise HardTanh. Any shape; float dtypes (ints clamp in-dtype)."""
    orig_shape = x.shape
    dtype = x.dtype
    n = x.size
    if n == 0:
        return x

    itemsize = jnp.dtype(dtype).itemsize
    # Sublane packing factor: 8 rows/vreg for 32-bit, 16 for 16-bit, 32 for 8-bit.
    row_align = max(8, 32 // itemsize)
    tile_bytes, vmem_limit = _tile_and_vmem_limit()

    cols = _choose_cols(n)
    if cols is not None:
        # ---- Lane-dense 2-D path (common case): no pad, no slice. ----
        rows = n // cols
        x2d = x.reshape(rows, cols)
        tile_rows = max(row_align,
                        (tile_bytes // (cols * itemsize)) // row_align * row_align)
        if tile_rows >= rows:
            if rows >= 2 * row_align:
                # Keep >= 2 grid steps so v7x shards across both TensorCores
                # and input/output DMAs still overlap.
                tile_rows = _round_up(pl.cdiv(rows, 2), row_align)
            else:
                tile_rows = rows          # single block; full dims are always legal
        grid = (pl.cdiv(rows, tile_rows),)   # partial last row-block is masked
        block = (tile_rows, cols)
        index_map = lambda i: (i, 0)
    else:
        # ---- Lane-unaligned path: (1, n) view, tiled along lanes. ----
        # The ragged last block is a partial block handled (masked) in-kernel,
        # so there is no jnp.pad and no [:n] slice -> no extra HBM passes.
        x2d = x.reshape(1, n)
        # A (1, c) block is padded to `row_align` sublanes in VMEM; divide by
        # row_align so the *padded* footprint still matches tile_bytes.
        c = (tile_bytes // itemsize) // row_align
        c = max(128, (c // 128) * 128)
        if c >= n:
            c = n                          # single full block (no alignment needed)
        grid = (pl.cdiv(n, c),)
        block = (1, c)
        index_map = lambda i: (0, i)

    kernel = functools.partial(_hardtanh_kernel, min_val=min_val, max_val=max_val)
    out2d = pl.pallas_call(
        kernel,
        out_shape=jax.ShapeDtypeStruct(x2d.shape, dtype),
        grid_spec=pltpu.PrefetchScalarGridSpec(
            num_scalar_prefetch=0,
            grid=grid,
            in_specs=[pl.BlockSpec(block, index_map)],
            out_specs=pl.BlockSpec(block, index_map),
        ),
        compiler_params=pltpu.CompilerParams(
            dimension_semantics=("parallel",),
            vmem_limit_bytes=vmem_limit,
        ),
        input_output_aliases=({0: 0} if donate else {}),
    )(x2d)

    return out2d.reshape(orig_shape)


if __name__ == "__main__":
    key = jax.random.PRNGKey(0)

    # Primary check: shape consistent with the module (elementwise, any shape).
    x = jax.random.normal(key, (2, 4, 16, 16), dtype=jnp.float32) * 2.0
    out = jax.block_until_ready(hardtanh(x, MIN_VAL, MAX_VAL))
    ref = jnp.clip(x, MIN_VAL, MAX_VAL)
    assert out.shape == x.shape
    assert out.dtype == x.dtype
    assert jnp.allclose(out, ref), "mismatch vs reference (lane-aligned path)"

    # Lane-unaligned size: exercises the masked partial-block path (no pad/slice).
    x2 = jax.random.normal(jax.random.PRNGKey(1), (3, 5, 7), dtype=jnp.float32) * 2.0
    out2 = jax.block_until_ready(hardtanh(x2, MIN_VAL, MAX_VAL))
    ref2 = jnp.clip(x2, MIN_VAL, MAX_VAL)
    assert out2.shape == x2.shape
    assert jnp.allclose(out2, ref2), "mismatch vs reference (unaligned path)"

    # bf16: exercises dtype-aware sublane alignment and in-dtype clamping.
    x3 = (jax.random.normal(jax.random.PRNGKey(2), (4, 256), dtype=jnp.float32)
          * 2.0).astype(jnp.bfloat16)
    out3 = jax.block_until_ready(hardtanh(x3, MIN_VAL, MAX_VAL))
    ref3 = jnp.clip(x3.astype(jnp.float32), MIN_VAL, MAX_VAL)
    assert out3.dtype == jnp.bfloat16
    assert jnp.allclose(out3.astype(jnp.float32), ref3), "mismatch (bf16 path)"

    print("KERNEL_OK")
</pallas_src>

<mosaic_0001>
module attributes {stable_mosaic.version = 11 : i64} {
  func.func @_hardtanh_kernel(%arg0: i32, %arg1: memref<1x2048xf32, #tpu.memory_space<vmem>>, %arg2: memref<1x2048xf32, #tpu.memory_space<vmem>>) attributes {dimension_semantics = [#tpu.dimension_semantics<parallel>], iteration_bounds = array<i64: 1>, scalar_prefetch = 0 : i64, scratch_operands = 0 : i64, tpu.core_type = #tpu.core_type<tc>, window_params = [{transform_indices = @transform_0, window_bounds = array<i64: 1, 2048>}, {transform_indices = @transform_1, window_bounds = array<i64: 1, 2048>}]} {
    %c0 = arith.constant 0 : index
    %c0_0 = arith.constant 0 : index
    %0 = vector.load %arg1[%c0, %c0_0] : memref<1x2048xf32, #tpu.memory_space<vmem>>, vector<1x2048xf32>
    %cst = arith.constant -1.000000e+00 : f32
    %1 = vector.broadcast %cst : f32 to vector<1x2048xf32>
    %2 = arith.maximumf %0, %1 : vector<1x2048xf32>
    %cst_1 = arith.constant 1.000000e+00 : f32
    %3 = vector.broadcast %cst_1 : f32 to vector<1x2048xf32>
    %4 = arith.minimumf %2, %3 : vector<1x2048xf32>
    %c0_2 = arith.constant 0 : index
    %c0_3 = arith.constant 0 : index
    %5 = vector.load %arg2[%c0_2, %c0_3] : memref<1x2048xf32, #tpu.memory_space<vmem>>, vector<1x2048xf32>
    tpu.vector_store %arg2[%c0_2, %c0_3], %4 {strides = array<i32>} : memref<1x2048xf32, #tpu.memory_space<vmem>>, vector<1x2048xf32>,
    return
  }
  func.func @transform_0(%arg0: i32) -> (i32, i32) {
    %c0_i32 = arith.constant 0 : i32
    %c0_i32_0 = arith.constant 0 : i32
    return %arg0, %c0_i32 : i32, i32
  }
  func.func @transform_1(%arg0: i32) -> (i32, i32) {
    %c0_i32 = arith.constant 0 : i32
    %c0_i32_0 = arith.constant 0 : i32
    return %arg0, %c0_i32 : i32, i32
  }
}

</mosaic_0001>

<bundles_post_ra>
// kernel: tpu_custom_call.1
= control target key start
LH: loop header
LB: loop body
LE: loop exit
PB: predicated region body
PF: predicated region fallthrough
CT: control target
= control target key end

     0   :  { %6 = vsyncpa [#allocation3], 0  ;;  %s132_s0 = inlined_call_operand.hbm [shape: f32[1,2048], index: 0, kind: input, shape index: {}]   ;;  %s133_s1 = inlined_call_operand.hbm [shape: f32[1,2048], index: 1, kind: output, shape index: {}]  }
   0x1   :  { %7 = vsyncpa [#allocation4], 0  ;;  %s96_s6 = smov [#allocation2]   ;;  %s48_s10 = scalar_lea.hbm %s132_s0, 256 }
   0x2   :  { %s14_s7 = sshll.u32 %s96_s6, 4  ;;  %p49_p0 = scmp.ne.s32.totalorder %s132_s0, %s48_s10  ;;  %s15_s7 = int_to_ptr.vmem [resolvable:$true] %s14_s7 }
   0x3   :  { %p52_p1 = scmp.lt.u32.totalorder %s48_s10, %s132_s0 }
   0x5   :  { %p54_p2 = pnand %p52_p1, %p49_p0 }
   0x7   :  { %57 = shalt.err (!%p54_p2)
}
   0x8   :  { %s58_s15 = scalar_lea.vmem %s15_s7, 256  ;;  %p63_p4 = scmp.lt.s32.totalorder %s15_s7, %s15_s7 }
   0x9   :  { %p59_p3 = scmp.ne.s32.totalorder %s15_s7, %s58_s15  ;;  %p64_p5 = scmp.lt.s32.totalorder %s58_s15, %s58_s15 }
   0xb   :  { %p65_p6 = por %p64_p5, %p63_p4 }
   0xd   :  { %p66_p7 = pnand %p65_p6, %p59_p3 }
   0xf   :  { %69 = shalt.err (!%p66_p7)
}
  0x10   :  { %17 = dma.hbm_to_vmem [thread:$0]  %s132_s0, 256, %s15_s7, [#allocation3]  }
  0x11   :  { %92 = dma.done.wait [#allocation3], 256  }
  0x12   :  { %93 = vsyncadd [#allocation3], 4294967040  ;;  %s97_s18 = smov [#allocation5]   ;;  %v21_v0 = vld [vmem:[#allocation2] sm:$0xff]  ;;  %v22_v1 = vld [vmem:[#allocation2 + $0x8] sm:$0xff] }
  0x13   :  { %s35_s19 = sshll.u32 %s97_s18, 4  ;;  %v44_v2 = vclamps-f32 %v21_v0, 1.0  ;;  %v45_v3 = vclamps-f32 %v22_v1, 1.0  ;;  %s36_s19 = int_to_ptr.vmem [resolvable:$true] %s35_s19 }
  0x14   :  { %s70_s20 = scalar_lea.vmem %s36_s19, 256  ;;  %p75_p9 = scmp.lt.s32.totalorder %s36_s19, %s36_s19 }
  0x15   :  { %27 = vst [vmem:[#allocation5] sm:$0xff] %v44_v2  ;;  %28 = vst [vmem:[#allocation5 + $0x8] sm:$0xff] %v45_v3  ;;  %p71_p8 = scmp.ne.s32.totalorder %s36_s19, %s70_s20  ;;  %p76_p10 = scmp.lt.s32.totalorder %s70_s20, %s70_s20 }
  0x17   :  { %p77_p11 = por %p76_p10, %p75_p9 }
  0x19   :  { %p78_p12 = pnand %p77_p11, %p71_p8 }
  0x1b   :  { %81 = shalt.err (!%p78_p12)
}
  0x1c   :  { %s82_s22 = scalar_lea.hbm %s133_s1, 256 }
  0x1d   :  { %p83_p13 = scmp.ne.s32.totalorder %s133_s1, %s82_s22  ;;  %p86_p0 = scmp.lt.u32.totalorder %s82_s22, %s133_s1 }
  0x1f   :  { %p88_p1 = pnand %p86_p0, %p83_p13 }
  0x21   :  { %91 = shalt.err (!%p88_p1)
}
  0x22   :  { %38 = dma.vmem_to_hbm [thread:$0]  %s36_s19, 256, %s133_s1, [#allocation4]  }
  0x23   :  { %94 = dma.done.wait [#allocation4], 256  }
  0x24   :  { %95 = vsyncadd [#allocation4], 4294967040 }
  0x25   :  { %42 = vsyncpa [#allocation3], 1 }
  0x26   :  { %43 = vsyncpa [#allocation4], 1 }

</bundles_post_ra>
